<compile_context>
chip_gen: v5e
topology: v5e:2x2
jax: 0.10.0
libtpu: 0.0.40
codegen_flags: <defaults>
</compile_context>

<pallas_src>
import jax
import jax.numpy as jnp
from jax.experimental import pallas as pl
from jax.experimental.pallas import tpu as pltpu


def _round_up(x, m):
    return (x + m - 1) // m * m


def _post_attention_kernel(x_ref, w_ref, b_ref, y_ref):
    # Single MXU matmul over the block-diagonal weight: (tile_b, K) x (K, N)
    # with f32 accumulation, then a whole-vreg bias add and one wide store.
    acc = jnp.dot(x_ref[...], w_ref[...], preferred_element_type=jnp.float32)
    bias = b_ref[...]                                   # (8, N) replicated
    reps = acc.shape[0] // bias.shape[0]                # static at trace time
    acc = acc + (bias if reps == 1 else jnp.tile(bias, (reps, 1)))
    y_ref[...] = acc.astype(y_ref.dtype)


def fused_post_attention(x, w, b, *, max_tile_b=512):
    """y = x @ W + b in one pallas_call.

    x: (B, K) f32 — concatenated flattened text|vis features (K = ti + vi)
    w: (K, N) f32 — block-diagonal weight, N = to_pad + vo_pad (128-multiples)
    b: (8, N) f32 — merged bias, replicated along 8 sublanes
    Returns (B, N) f32 (padded columns are exact zeros).
    """
    B, K = x.shape
    Kw, N = w.shape
    assert K == Kw and b.shape == (8, N)

    # Sublane-aligned batch tile; big tiles amortize the ~0.35 us/step cost.
    tile_b = min(_round_up(B, 8), max_tile_b)
    # v7x has 2 TensorCores: if the whole batch fits one step but could be
    # split, halve the tile so the "parallel" axis has >= 2 steps.
    if B > 8 and pl.cdiv(B, tile_b) < 2:
        tile_b = max(8, _round_up(-(-B // 2), 8))
    grid = (pl.cdiv(B, tile_b),)

    flops = 2 * B * K * N
    bytes_accessed = 4 * (B * (K + N) + K * N + b.size)

    return pl.pallas_call(
        _post_attention_kernel,
        out_shape=jax.ShapeDtypeStruct((B, N), jnp.float32),
        grid=grid,
        in_specs=[
            pl.BlockSpec((tile_b, K), lambda i: (i, 0)),  # activation tile
            pl.BlockSpec((K, N), lambda i: (0, 0)),       # weight (resident)
            pl.BlockSpec((8, N), lambda i: (0, 0)),       # bias   (resident)
        ],
        out_specs=pl.BlockSpec((tile_b, N), lambda i: (i, 0)),
        compiler_params=pltpu.CompilerParams(
            dimension_semantics=("parallel",)),
        cost_estimate=pl.CostEstimate(flops=flops, transcendentals=0,
                                      bytes_accessed=bytes_accessed),
    )(x, w, b)


class PostAttentionPallas:
    """JAX/Pallas port of PostAttention (two flatten+Linear heads, fused)."""

    def __init__(self, text_emb_size, text_enc_dim, hidden_size,
                 img_enc_cnn, vis_emb_size, vis_enc_dim, key):
        k1, k2, k3, k4 = jax.random.split(key, 4)
        t_bound = 1.0 / (text_emb_size ** 0.5)
        v_bound = 1.0 / (vis_emb_size ** 0.5)
        self.ti = text_emb_size
        self.vi = vis_emb_size
        self.text_enc_dim = text_enc_dim
        self.vis_enc_dim = vis_enc_dim
        self.to_p = _round_up(text_enc_dim, 128)
        self.vo_p = _round_up(vis_enc_dim, 128)

        # nn.Linear convention is (out, in); generate that, then hoist the
        # transpose + block-diagonal merge + 128-lane zero padding to init.
        text_w = jax.random.uniform(k1, (text_enc_dim, text_emb_size),
                                    jnp.float32, -t_bound, t_bound)
        text_b = jax.random.uniform(k2, (text_enc_dim,),
                                    jnp.float32, -t_bound, t_bound)
        vis_w = jax.random.uniform(k3, (vis_enc_dim, vis_emb_size),
                                   jnp.float32, -v_bound, v_bound)
        vis_b = jax.random.uniform(k4, (vis_enc_dim,),
                                   jnp.float32, -v_bound, v_bound)

        K = text_emb_size + vis_emb_size
        N = self.to_p + self.vo_p
        W = jnp.zeros((K, N), jnp.float32)
        W = W.at[:text_emb_size, :text_enc_dim].set(text_w.T)
        W = W.at[text_emb_size:, self.to_p:self.to_p + vis_enc_dim].set(vis_w.T)
        self.W = W

        bias = jnp.zeros((8, N), jnp.float32)           # sublane-replicated
        bias = bias.at[:, :text_enc_dim].set(text_b)
        bias = bias.at[:, self.to_p:self.to_p + vis_enc_dim].set(vis_b)
        self.b = bias

    def __call__(self, x_text, x_vis):
        batch_size = x_vis.shape[0]
        # glue: view(B, -1) for both streams, then one lane-axis concat so the
        # kernel does a single wide matmul.
        x = jnp.concatenate([x_text.reshape(batch_size, -1),
                             x_vis.reshape(batch_size, -1)], axis=1)
        y = fused_post_attention(x, self.W, self.b)
        text_out = y[:, :self.text_enc_dim]
        vis_out = y[:, self.to_p:self.to_p + self.vis_enc_dim]
        return text_out, vis_out


if __name__ == "__main__":
    key = jax.random.PRNGKey(0)
    k_params, k_text, k_vis = jax.random.split(key, 3)

    # Small shapes consistent with the forward:
    #   x_text: (B, seq, emb) flattening to text_emb_size = 4*8 = 32
    #   x_vis : (B, C, H, W) flattening to vis_emb_size  = 4*4*4 = 64
    B = 2
    text_emb_size, text_enc_dim = 32, 16
    vis_emb_size, vis_enc_dim = 64, 32
    hidden_size, img_enc_cnn = 32, None  # unused by forward (as in the module)

    model = PostAttentionPallas(text_emb_size, text_enc_dim, hidden_size,
                                img_enc_cnn, vis_emb_size, vis_enc_dim, k_params)

    x_text = jax.random.normal(k_text, (B, 4, 8), jnp.float32)
    x_vis = jax.random.normal(k_vis, (B, 4, 4, 4), jnp.float32)

    t_out, v_out = model(x_text, x_vis)
    jax.block_until_ready((t_out, v_out))

    # Reference check against plain-JAX linear (un-padded weight/bias slices).
    xt_flat = x_text.reshape(B, -1)
    xv_flat = x_vis.reshape(B, -1)
    t_ref = (xt_flat @ model.W[:text_emb_size, :text_enc_dim]
             + model.b[0, :text_enc_dim])
    v_ref = (xv_flat @ model.W[text_emb_size:, model.to_p:model.to_p + vis_enc_dim]
             + model.b[0, model.to_p:model.to_p + vis_enc_dim])
    assert t_out.shape == (B, text_enc_dim) and v_out.shape == (B, vis_enc_dim)
    assert jnp.allclose(t_out, t_ref, atol=1e-5)
    assert jnp.allclose(v_out, v_ref, atol=1e-5)

    print("KERNEL_OK")
</pallas_src>

<mosaic_0001>
module attributes {stable_mosaic.version = 11 : i64} {
  func.func @_post_attention_kernel(%arg0: i32, %arg1: memref<8x96xf32, #tpu.memory_space<vmem>>, %arg2: memref<96x256xf32, #tpu.memory_space<vmem>>, %arg3: memref<8x256xf32, #tpu.memory_space<vmem>>, %arg4: memref<8x256xf32, #tpu.memory_space<vmem>>) attributes {dimension_semantics = [#tpu.dimension_semantics<parallel>], iteration_bounds = array<i64: 1>, scalar_prefetch = 0 : i64, scratch_operands = 0 : i64, tpu.core_type = #tpu.core_type<tc>, window_params = [{transform_indices = @transform_0, window_bounds = array<i64: 8, 96>}, {pipeline_mode = #tpu.pipeline_mode<synchronous>, transform_indices = @transform_1, window_bounds = array<i64: 96, 256>}, {pipeline_mode = #tpu.pipeline_mode<synchronous>, transform_indices = @transform_2, window_bounds = array<i64: 8, 256>}, {transform_indices = @transform_3, window_bounds = array<i64: 8, 256>}]} {
    %c0 = arith.constant 0 : index
    %c0_0 = arith.constant 0 : index
    %0 = vector.load %arg1[%c0, %c0_0] : memref<8x96xf32, #tpu.memory_space<vmem>>, vector<8x96xf32>
    %c0_1 = arith.constant 0 : index
    %c0_2 = arith.constant 0 : index
    %1 = vector.load %arg2[%c0_1, %c0_2] : memref<96x256xf32, #tpu.memory_space<vmem>>, vector<96x256xf32>
    %cst = arith.constant dense<0.000000e+00> : vector<8x256xf32>
    %2 = tpu.matmul %0, %1, %cst {dimension_numbers = #tpu.dot_dimension_numbers<[1], [0], [0], [1], [0, 0, 1, 1], [], []>} : vector<8x96xf32>, vector<96x256xf32>, vector<8x256xf32> -> vector<8x256xf32>
    %c0_3 = arith.constant 0 : index
    %c0_4 = arith.constant 0 : index
    %3 = vector.load %arg3[%c0_3, %c0_4] : memref<8x256xf32, #tpu.memory_space<vmem>>, vector<8x256xf32>
    %4 = arith.addf %2, %3 : vector<8x256xf32>
    %c0_5 = arith.constant 0 : index
    %c0_6 = arith.constant 0 : index
    %5 = vector.load %arg4[%c0_5, %c0_6] : memref<8x256xf32, #tpu.memory_space<vmem>>, vector<8x256xf32>
    tpu.vector_store %arg4[%c0_5, %c0_6], %4 {strides = array<i32>} : memref<8x256xf32, #tpu.memory_space<vmem>>, vector<8x256xf32>,
    return
  }
  func.func @transform_0(%arg0: i32) -> (i32, i32) {
    %c0_i32 = arith.constant 0 : i32
    %c0_i32_0 = arith.constant 0 : i32
    return %arg0, %c0_i32 : i32, i32
  }
  func.func @transform_1(%arg0: i32) -> (i32, i32) {
    %c0_i32 = arith.constant 0 : i32
    %c0_i32_0 = arith.constant 0 : i32
    %c0_i32_1 = arith.constant 0 : i32
    return %c0_i32, %c0_i32_0 : i32, i32
  }
  func.func @transform_2(%arg0: i32) -> (i32, i32) {
    %c0_i32 = arith.constant 0 : i32
    %c0_i32_0 = arith.constant 0 : i32
    %c0_i32_1 = arith.constant 0 : i32
    return %c0_i32, %c0_i32_0 : i32, i32
  }
  func.func @transform_3(%arg0: i32) -> (i32, i32) {
    %c0_i32 = arith.constant 0 : i32
    %c0_i32_0 = arith.constant 0 : i32
    return %arg0, %c0_i32 : i32, i32
  }
}

</mosaic_0001>

<bundles_post_ra>
// kernel: tpu_custom_call.1
= control target key start
LH: loop header
LB: loop body
LE: loop exit
PB: predicated region body
PF: predicated region fallthrough
CT: control target
= control target key end

     0   :  { %8 = vsyncpa [#allocation3], 0  ;;  %s329_s0 = inlined_call_operand.hbm [shape: f32[2,96], index: 0, kind: input, shape index: {}]   ;;  %s330_s1 = inlined_call_operand.hbm [shape: f32[96,256], index: 1, kind: input, shape index: {}]   ;;  %s331_s2 = inlined_call_operand.hbm [shape: f32[8,256], index: 2, kind: input, shape index: {}]   ;;  %s332_s3 = inlined_call_operand.hbm [shape: f32[2,256], index: 3, kind: output, shape index: {}]  }
   0x1   :  { %9 = vsyncpa [#allocation6], 0 }
   0x2   :  { %10 = vsyncpa [#allocation4], 0  ;;  %s28_s14 = sshll.u32 %s330_s1, 4  ;;  %s29_s14 = int_to_ptr.hbm [resolvable:$true] %s28_s14 }
   0x3   :  { %14 = vsyncadd [#allocation3], 96  ;;  %s287_s15 = smov [#allocation5]   ;;  %s15_s19 = sshll.u32 %s329_s0, 4  ;;  %s16_s19 = int_to_ptr.hbm [resolvable:$true] %s15_s19 }
   0x4   :  { %s30_s16 = sshll.u32 %s287_s15, 4  ;;  %s288_s20 = smov 256   ;;  %s31_s16 = int_to_ptr.vmem [resolvable:$true] %s30_s16 }
   0x5   :  { %s289_s21 = smov 16   ;;  %s290_s22 = smov [#allocation2]  }
   0x6   :  { %36 = dma.hbm_to_vmem [thread:$0]  %s29_s14, 3072, %s31_s16, [#allocation6], %s288_s20, %s288_s20, %s289_s21  }
   0x7   :  { %s17_s23 = sshll.u32 %s290_s22, 4  ;;  %s291_s24 = smov 32   ;;  %s18_s23 = int_to_ptr.vmem [resolvable:$true] %s17_s23 }
   0x8   :  { %s292_s25 = smov 2   ;;  %s42_s27 = sshll.u32 %s331_s2, 4  ;;  %s43_s27 = int_to_ptr.hbm [resolvable:$true] %s42_s27 }
   0x9   :  { %23 = dma.hbm_to_vmem [thread:$0]  %s16_s19, 32, %s18_s23, [#allocation3], %s291_s24, %s291_s24, %s292_s25  }
   0xa   :  { %s293_s28 = smov [#allocation7]  }
   0xb   :  { %s44_s29 = sshll.u32 %s293_s28, 4  ;;  %s45_s29 = int_to_ptr.vmem [resolvable:$true] %s44_s29 }
   0xc   :  { %47 = dma.hbm_to_vmem [thread:$0]  %s43_s27, 256, %s45_s29, [#allocation6]  }
   0xd   :  { %281 = dma.done.wait [#allocation3], 128  }
   0xe   :  { %282 = vsyncadd [#allocation3], 4294967168 }
   0xf   :  { %283 = dma.done.wait [#allocation6], 3328  }
  0x10   :  { %284 = vsyncadd [#allocation6], 4294963968  ;;  %v84_v0 = vld [vmem:[#allocation5 + $0xb8] sm:$0xff]  ;;  %v83_v1 = vld [vmem:[#allocation5 + $0xb0] sm:$0xff]  ;;  %vm87_vm0 = vcmask 785408   ;;  %vm134_vm1 = vcmask 1041408  }
  0x11   :  { %v82_v2 = vld [vmem:[#allocation5 + $0xa8] sm:$0xff]  ;;  %115 = vmatpush.msra.mxu1 %v84_v0  ;;  %95 = vmatpush.msra.mxu0 %v83_v1  ;;  %v81_v3 = vld [vmem:[#allocation5 + $0xa0] sm:$0xff]  ;;  %v80_v4 = vld [vmem:[#allocation5 + $0x98] sm:$0xff]  ;;  %vm136_vm2 = vcmask 1043458   ;;  %vm139_vm3 = vcmask 1045508   ;;  %vm142_vm4 = vcmask 1045504  }
  0x12   :  { %v79_v5 = vld [vmem:[#allocation5 + $0x90] sm:$0xff]  ;;  %v78_v6 = vld [vmem:[#allocation5 + $0x88] sm:$0xff]  ;;  %v77_v7 = vld [vmem:[#allocation5 + $0x80] sm:$0xff] }
  0x13   :  { %116 = vmatpush.msra.mxu1 %v82_v2  ;;  %96 = vmatpush.msra.mxu0 %v81_v3  ;;  %v76_v8 = vld [vmem:[#allocation5 + $0x78] sm:$0xff]  ;;  %v75_v9 = vld [vmem:[#allocation5 + $0x70] sm:$0xff]  ;;  %v74_v10 = vld [vmem:[#allocation5 + $0x68] sm:$0xff] }
  0x14   :  { %v73_v11 = vld [vmem:[#allocation5 + $0x60] sm:$0xff]  ;;  %v72_v12 = vld [vmem:[#allocation5 + $0x58] sm:$0xff]  ;;  %v71_v13 = vld [vmem:[#allocation5 + $0x50] sm:$0xff] }
  0x15   :  { %117 = vmatpush.msra.mxu1 %v80_v4  ;;  %97 = vmatpush.msra.mxu0 %v79_v5  ;;  %v70_v14 = vld [vmem:[#allocation5 + $0x48] sm:$0xff]  ;;  %v69_v15 = vld [vmem:[#allocation5 + $0x40] sm:$0xff]  ;;  %v68_v16 = vld [vmem:[#allocation5 + $0x38] sm:$0xff] }
  0x16   :  { %v67_v17 = vld [vmem:[#allocation5 + $0x30] sm:$0xff]  ;;  %v66_v18 = vld [vmem:[#allocation5 + $0x28] sm:$0xff]  ;;  %v65_v19 = vld [vmem:[#allocation5 + $0x20] sm:$0xff] }
  0x17   :  { %118 = vmatpush.msra.mxu1 %v78_v6  ;;  %98 = vmatpush.msra.mxu0 %v77_v7  ;;  %v64_v20 = vld [vmem:[#allocation5 + $0x18] sm:$0xff]  ;;  %v63_v21 = vld [vmem:[#allocation5 + $0x10] sm:$0xff]  ;;  %v62_v22 = vld [vmem:[#allocation5 + $0x8] sm:$0xff] }
  0x18   :  { %v61_v23 = vld [vmem:[#allocation5] sm:$0xff]  ;;  %v60_v24 = vld [vmem:[#allocation2] sm:$0xff]  ;;  %v86_v25 = vld [vmem:[#allocation7 + $0x8] sm:$0xff] }
  0x19   :  { %119 = vmatpush.msra.mxu1 %v76_v8  ;;  %99 = vmatpush.msra.mxu0 %v75_v9  ;;  %v85_v26 = vld [vmem:[#allocation7] sm:$0xff] }
  0x1b   :  { %120 = vmatpush.msra.mxu1 %v74_v10  ;;  %100 = vmatpush.msra.mxu0 %v73_v11 }
  0x1d   :  { %121 = vmatpush.msra.mxu1 %v72_v12  ;;  %101 = vmatpush.msra.mxu0 %v71_v13 }
  0x1f   :  { %122 = vmatpush.msra.mxu1 %v70_v14  ;;  %102 = vmatpush.msra.mxu0 %v69_v15 }
  0x21   :  { %123 = vmatpush.msra.mxu1 %v68_v16  ;;  %103 = vmatpush.msra.mxu0 %v67_v17 }
  0x23   :  { %124 = vmatpush.msra.mxu1 %v66_v18  ;;  %104 = vmatpush.msra.mxu0 %v65_v19 }
  0x25   :  { %125 = vmatpush.msra.mxu1 %v64_v20  ;;  %105 = vmatpush.msra.mxu0 %v63_v21 }
  0x27   :  { %126 = vmatpush.msra.mxu1 %v62_v22  ;;  %106 = vmatpush.msra.mxu0 %v61_v23 }
  0x28   :  { %174 = vmatmul.msk.f32.vlgmr.msra.gmra.mxu1 %vm87_vm0, %v60_v24  ;;  %173 = vmatmul.msk.f32.vlgmr.msra.gmra.mxu0 %vm87_vm0, %v60_v24 }
  0xa5   :  { %v128_v27 = vpop.f32.mrf.mxu1  ;;  %v108_v28 = vpop.f32.mrf.mxu0 }
  0xa6   :  { %v129_v29 = vadd.f32 %v128_v27, %v86_v25  ;;  %v109_v30 = vadd.f32 %v108_v28, %v85_v26 }
  0xa8   :  { %v133_v31 = vrot.slane %v129_v29, 6 }
  0xaa   :  { %v135_v32 = vsel %vm134_vm1, %v109_v30, %v133_v31  ;;  %v137_v33 = vsel %vm136_vm2, %v109_v30, %v133_v31  ;;  %v140_v34 = vsel %vm139_vm3, %v109_v30, %v133_v31  ;;  %v143_v35 = vsel %vm142_vm4, %v133_v31, %v109_v30 }
  0xab   :  { %v138_v36 = vrot.slane %v137_v33, 2  ;;  %v141_v37 = vrot.slane %v140_v34, 4  ;;  %v144_v38 = vrot.slane %v143_v35, 6  ;;  %149 = vst [vmem:[#allocation8] sm:$0xf] %v135_v32 }
  0xad   :  { %150 = vst [vmem:[#allocation8 + $0x4] sm:$0xf] %v138_v36 }
  0xae   :  { %151 = vst [vmem:[#allocation8 + $0x8] sm:$0xf] %v141_v37 }
  0xaf   :  { %152 = vst [vmem:[#allocation8 + $0xc] sm:$0xf] %v144_v38 }
  0xb0   :  { %156 = vsyncadd [#allocation4], 192  ;;  %s159_s30 = sshll.u32 %s332_s3, 4  ;;  %s294_s4 = smov [#allocation8]   ;;  %s160_s30 = int_to_ptr.hbm [resolvable:$true] %s159_s30 }
  0xb1   :  { %s157_s5 = sshll.u32 %s294_s4, 4  ;;  %s295_s6 = smov 64   ;;  %s158_s5 = int_to_ptr.vmem [resolvable:$true] %s157_s5 }
  0xb2   :  { %s296_s7 = smov 4  }
  0xb3   :  { %165 = dma.vmem_to_hbm [thread:$0]  %s158_s5, 64, %s160_s30, [#allocation4], %s295_s6, %s295_s6, %s296_s7  }
  0xb4   :  { %285 = dma.done.wait [#allocation4], 256  }
  0xb5   :  { %286 = vsyncadd [#allocation4], 4294967040 }
  0xb6   :  { %170 = vsyncpa [#allocation3], 1 }
  0xb7   :  { %171 = vsyncpa [#allocation6], 1 }
  0xb8   :  { %172 = vsyncpa [#allocation4], 1 }

</bundles_post_ra>
